<compile_context>
chip_gen: v7x
topology: tpu7x:2x2x1
jax: 0.10.0
libtpu: 0.0.40
codegen_flags: <defaults>
</compile_context>

<pallas_src>
import jax
import jax.numpy as jnp
from jax.experimental import pallas as pl
from jax.experimental.pallas import tpu as pltpu


def _jacobian_kernel(x_ref, w_ref, wt_ref, v_ref, jac_ref):
    """One batch tile: Jac = d(tanh(x@W)@v)/dx, analytic VJP.

    x_ref:   [TB, D] VMEM, bf16 batch tile of the input
    w_ref:   [D,  H] VMEM, bf16, resident (Buffered(1))
    wt_ref:  [H,  D] VMEM, bf16, resident pre-transposed W (Buffered(1))
    v_ref:   [1,  H] VMEM, f32 lane-major readout vector, resident
    jac_ref: [TB, D] VMEM f32 output == batchScalarJacobian_AD(x, y)
    """
    x = x_ref[...]                     # bf16 straight into the MXU
    w = w_ref[...]
    wt = wt_ref[...]
    v_row = v_ref[...]                 # [1, H] f32 (VPU-only)

    # forward: z = x @ W (bf16 x bf16 -> f32 accumulate on the MXU), t = tanh(z) (EUP, f32)
    z = jnp.dot(x, w, preferred_element_type=jnp.float32)        # [TB, H]
    t = jnp.tanh(z)                                               # [TB, H] f32

    # cotangent wrt z with grad_outputs = ones:
    #   g[b,h] = v[h] * (1 - t[b,h]^2)  ==  v - v*t*t   (single fused VPU expr)
    g = v_row - v_row * (t * t)                                   # [TB, H] f32

    # Jac = g @ W^T via the pre-transposed resident wT -> canonical (m,k)x(k,n)
    # MXU dot, no in-kernel transpose. g is truncated to bf16 for the MXU feed
    # (documented; acceptable), accumulation stays f32.
    jac = jnp.dot(g.astype(wt.dtype), wt,
                  preferred_element_type=jnp.float32)             # [TB, D]
    jac_ref[...] = jac.astype(jac_ref.dtype)


def _vmem_limit_bytes():
    """Generation-aware scoped-VMEM budget (headroom for compiler scratch)."""
    cap = 128 * 1024 * 1024
    try:
        cap = int(pltpu.get_tpu_info().vmem_capacity_bytes)
    except Exception:
        pass
    # 3/4 of physical, capped: v5e/v6e (128 MiB) -> 96 MiB, v7x (64 MiB) -> 48 MiB.
    return min(cap * 3 // 4, 100 * 1024 * 1024)


def jacobian_pallas(x, w, v, *, tb=None, mxu_dtype=jnp.bfloat16):
    """Returns Jac [B, D] = d/dx of y = tanh(x @ W) @ v  (batched scalar y).

    Batch-tiled grid: x / Jac tiles are double-buffered HBM<->VMEM by the
    BlockSpec pipeline while W, W^T and v stay VMEM-resident (Buffered(1)).
    """
    B, D = x.shape
    Dw, H = w.shape
    assert Dw == D and v.shape == (H, 1)

    # bf16 MXU operand feed (f32 accumulation stays in-kernel).
    x_mx = x.astype(mxu_dtype)
    w_mx = w.astype(mxu_dtype)
    wt_mx = jnp.transpose(w_mx)                     # pre-transposed once in XLA
    v_row = v.reshape(1, H).astype(jnp.float32)     # lane-major readout vector

    if tb is None:
        # Largest MXU-friendly tile that still leaves >= 2 grid steps
        # (keeps both v7x TensorCores busy); tiny B -> single grid step.
        tb = B
        for cand in (256, 128):
            if B % cand == 0 and B // cand >= 2:
                tb = cand
                break
    assert B % tb == 0, "batch tile must divide B"
    assert tb % 16 == 0 or tb == B, "bf16 batch tile must be 16-aligned"
    grid = (B // tb,)

    itemsize = jnp.dtype(mxu_dtype).itemsize
    flops = 4 * B * D * H + 6 * B * H               # two matmuls + elementwise
    bytes_accessed = (B * D * itemsize              # x in (bf16)
                      + 2 * D * H * itemsize        # W, W^T in (bf16)
                      + H * 4                       # v in (f32)
                      + B * D * 4)                  # Jac out (f32)
    cost = pl.CostEstimate(flops=flops, transcendentals=B * H,
                           bytes_accessed=bytes_accessed)

    jac = pl.pallas_call(
        _jacobian_kernel,
        out_shape=jax.ShapeDtypeStruct((B, D), jnp.float32),
        grid_spec=pltpu.PrefetchScalarGridSpec(
            num_scalar_prefetch=0,
            grid=grid,
            in_specs=[
                pl.BlockSpec((tb, D), lambda i: (i, 0)),          # x: batch-tiled
                pl.BlockSpec((D, H), lambda i: (0, 0),
                             pipeline_mode=pl.Buffered(1)),       # W: resident
                pl.BlockSpec((H, D), lambda i: (0, 0),
                             pipeline_mode=pl.Buffered(1)),       # W^T: resident
                pl.BlockSpec((1, H), lambda i: (0, 0),
                             pipeline_mode=pl.Buffered(1)),       # v: resident
            ],
            out_specs=pl.BlockSpec((tb, D), lambda i: (i, 0)),    # Jac: lane-dense
        ),
        compiler_params=pltpu.CompilerParams(
            dimension_semantics=("parallel",),                    # megacore-shardable
            vmem_limit_bytes=_vmem_limit_bytes(),
        ),
        cost_estimate=cost,
    )(x_mx, w_mx, wt_mx, v_row)
    return jac


def _func_ref(x, w, v):
    """Pure-JAX reference of the in-script `func` (batched scalar y)."""
    return jnp.tanh(x @ w) @ v  # [B, 1]


if __name__ == "__main__":
    key = jax.random.PRNGKey(0)
    kx, kw, kv = jax.random.split(key, 3)

    # Lane-dense shapes (D, H multiples of 128); B sized so the default tile
    # (tb=128) yields a 2-step "parallel" batch grid (both v7x TCs get work).
    B, D, H = 256, 128, 128
    x = jax.random.normal(kx, (B, D), dtype=jnp.float32)
    # deterministic "parameters" of the function whose Jacobian we take
    w = 0.1 * jax.random.normal(kw, (D, H), dtype=jnp.float32)
    v = 0.1 * jax.random.normal(kv, (H, 1), dtype=jnp.float32)

    jac = jacobian_pallas(x, w, v)
    jax.block_until_ready(jac)

    # Reference: per-sample grad of the scalar output w.r.t. its input via JAX
    # autodiff on the same func, using the same bf16-rounded operands the MXU sees.
    x32 = x.astype(jnp.bfloat16).astype(jnp.float32)
    w32 = w.astype(jnp.bfloat16).astype(jnp.float32)
    jac_ref = jax.vmap(
        jax.grad(lambda xi: _func_ref(xi[None, :], w32, v)[0, 0])
    )(x32)

    assert jac.shape == (B, D)
    max_err = float(jnp.max(jnp.abs(jac - jac_ref)))
    assert jnp.allclose(jac, jac_ref, atol=1e-2, rtol=1e-2), max_err
    print("KERNEL_OK")
</pallas_src>

<mosaic_0001>
module attributes {stable_mosaic.version = 11 : i64} {
  func.func @_jacobian_kernel(%arg0: i32, %arg1: memref<128x128xbf16, #tpu.memory_space<vmem>>, %arg2: memref<128x128xbf16, #tpu.memory_space<vmem>>, %arg3: memref<128x128xbf16, #tpu.memory_space<vmem>>, %arg4: memref<1x128xf32, #tpu.memory_space<vmem>>, %arg5: memref<128x128xf32, #tpu.memory_space<vmem>>) attributes {dimension_semantics = [#tpu.dimension_semantics<parallel>], iteration_bounds = array<i64: 2>, scalar_prefetch = 0 : i64, scratch_operands = 0 : i64, tpu.core_type = #tpu.core_type<tc>, window_params = [{transform_indices = @transform_0, window_bounds = array<i64: 128, 128>}, {pipeline_mode = #tpu.pipeline_mode<synchronous>, transform_indices = @transform_1, window_bounds = array<i64: 128, 128>}, {pipeline_mode = #tpu.pipeline_mode<synchronous>, transform_indices = @transform_2, window_bounds = array<i64: 128, 128>}, {pipeline_mode = #tpu.pipeline_mode<synchronous>, transform_indices = @transform_3, window_bounds = array<i64: 1, 128>}, {transform_indices = @transform_4, window_bounds = array<i64: 128, 128>}]} {
    %c0 = arith.constant 0 : index
    %c0_0 = arith.constant 0 : index
    %0 = vector.load %arg1[%c0, %c0_0] : memref<128x128xbf16, #tpu.memory_space<vmem>>, vector<128x128xbf16>
    %c0_1 = arith.constant 0 : index
    %c0_2 = arith.constant 0 : index
    %1 = vector.load %arg2[%c0_1, %c0_2] : memref<128x128xbf16, #tpu.memory_space<vmem>>, vector<128x128xbf16>
    %c0_3 = arith.constant 0 : index
    %c0_4 = arith.constant 0 : index
    %2 = vector.load %arg3[%c0_3, %c0_4] : memref<128x128xbf16, #tpu.memory_space<vmem>>, vector<128x128xbf16>
    %c0_5 = arith.constant 0 : index
    %c0_6 = arith.constant 0 : index
    %3 = vector.load %arg4[%c0_5, %c0_6] : memref<1x128xf32, #tpu.memory_space<vmem>>, vector<1x128xf32>
    %cst = arith.constant dense<0.000000e+00> : vector<128x128xf32>
    %4 = tpu.matmul %0, %1, %cst {dimension_numbers = #tpu.dot_dimension_numbers<[1], [0], [0], [1], [0, 0, 1, 1], [], []>} : vector<128x128xbf16>, vector<128x128xbf16>, vector<128x128xf32> -> vector<128x128xf32>
    %5 = math.tanh %4 : vector<128x128xf32>
    %6 = arith.mulf %5, %5 : vector<128x128xf32>
    %7 = vector.broadcast %3 : vector<1x128xf32> to vector<128x128xf32>
    %8 = arith.mulf %7, %6 : vector<128x128xf32>
    %9 = vector.broadcast %3 : vector<1x128xf32> to vector<128x128xf32>
    %10 = arith.subf %9, %8 : vector<128x128xf32>
    %11 = arith.truncf %10 : vector<128x128xf32> to vector<128x128xbf16>
    %cst_7 = arith.constant dense<0.000000e+00> : vector<128x128xf32>
    %12 = tpu.matmul %11, %2, %cst_7 {dimension_numbers = #tpu.dot_dimension_numbers<[1], [0], [0], [1], [0, 0, 1, 1], [], []>} : vector<128x128xbf16>, vector<128x128xbf16>, vector<128x128xf32> -> vector<128x128xf32>
    %c0_8 = arith.constant 0 : index
    %c0_9 = arith.constant 0 : index
    %13 = vector.load %arg5[%c0_8, %c0_9] : memref<128x128xf32, #tpu.memory_space<vmem>>, vector<128x128xf32>
    tpu.vector_store %arg5[%c0_8, %c0_9], %12 {strides = array<i32>} : memref<128x128xf32, #tpu.memory_space<vmem>>, vector<128x128xf32>,
    return
  }
  func.func @transform_0(%arg0: i32) -> (i32, i32) {
    %c0_i32 = arith.constant 0 : i32
    %c0_i32_0 = arith.constant 0 : i32
    return %arg0, %c0_i32 : i32, i32
  }
  func.func @transform_1(%arg0: i32) -> (i32, i32) {
    %c0_i32 = arith.constant 0 : i32
    %c0_i32_0 = arith.constant 0 : i32
    %c0_i32_1 = arith.constant 0 : i32
    return %c0_i32, %c0_i32_0 : i32, i32
  }
  func.func @transform_2(%arg0: i32) -> (i32, i32) {
    %c0_i32 = arith.constant 0 : i32
    %c0_i32_0 = arith.constant 0 : i32
    %c0_i32_1 = arith.constant 0 : i32
    return %c0_i32, %c0_i32_0 : i32, i32
  }
  func.func @transform_3(%arg0: i32) -> (i32, i32) {
    %c0_i32 = arith.constant 0 : i32
    %c0_i32_0 = arith.constant 0 : i32
    %c0_i32_1 = arith.constant 0 : i32
    return %c0_i32, %c0_i32_0 : i32, i32
  }
  func.func @transform_4(%arg0: i32) -> (i32, i32) {
    %c0_i32 = arith.constant 0 : i32
    %c0_i32_0 = arith.constant 0 : i32
    return %arg0, %c0_i32 : i32, i32
  }
}

</mosaic_0001>

<bundles_post_ra>
// kernel: tpu_custom_call.1
= control target key start
LH: loop header
LB: loop body
LE: loop exit
PB: predicated region body
PF: predicated region fallthrough
CT: control target
= control target key end

     0   :  { %9 = vsyncpa [#allocation3], 0  ;;  %s1694_s0 = inlined_call_operand.hbm [shape: bf16[256,128], index: 0, kind: input, shape index: {}]   ;;  %s1695_s1 = inlined_call_operand.hbm [shape: bf16[128,128], index: 1, kind: input, shape index: {}]   ;;  %s1696_s2 = inlined_call_operand.hbm [shape: bf16[128,128], index: 2, kind: input, shape index: {}]   ;;  %s1697_s3 = inlined_call_operand.hbm [shape: f32[1,128], index: 3, kind: input, shape index: {}]   ;;  %s1698_s4 = inlined_call_operand.hbm [shape: f32[256,128], index: 4, kind: output, shape index: {}]  }
   0x1   :  { %11 = vsyncpa [#allocation3 + $0x1], 0 }
   0x2   :  { %12 = vsyncpa [#allocation6], 0 }
   0x3   :  { %13 = vsyncpa [#allocation9], 0 }
   0x4   :  { %14 = vsyncpa [#allocation4], 0 }
   0x5   :  { %16 = vsyncpa [#allocation4 + $0x1], 0  ;;  %s1362_s15 = smov 0   ;;  %s1364_s16 = smov 0  }
   0x6   :  { %s1366_s17 = smov 0   ;;  %s1368_s18 = smov 0  }
   0x7 LB: > { %s1383_s19 = sadd.s32 4294967295, %s1326_s18   ;;  %s858_s20 = sadd.s32 4294967294, %s1326_s18   ;;  %s1326_s18 = sphi %s1368_s18, %s1721_s18   ;;  %s1322_s17 = sphi %s1366_s17, %s1720_s17   ;;  %s1318_s16 = sphi %s1364_s16, %s1719_s16   ;;  %s1314_s15 = sphi %s1362_s15, %s1718_s15  }
   0x8   : > { %p42_p0 = scmp.ne.s32.totalorder %s1318_s16, %s1314_s15  ;;  %p1699_p1 = scmp.eq.s32.totalorder %s1383_s19, 0 }
   0x9   : > { %p135_p3 = scmp.eq.s32.totalorder %s858_s20, 1  ;;  %p859_p5 = scmp.ge.s32.totalorder %s1326_s18, 1 }
   0xa   : > { %p1392_p4 = por %p1699_p1, %p42_p0  ;;  %p142_p7 = scmp.lt.s32.totalorder %s1326_s18, 3 }
   0xb   : > { %p1397_p6 = por %p135_p3, %p42_p0  ;;  %s1328_s24 = smov [#allocation5]  }
   0xc   : > { %s1702_s21 = scalar_select %p1392_p4, 1, 0 }
   0xd   : > { %s1703_s22 = scalar_select %p1397_p6, 1, 0 }
   0xe   : > { %p1402_p8 = pnand %p859_p5, %p142_p7  ;;  %s154_s25 = sshll.u32 %s1328_s24, 4  ;;  %s1406_s25 = int_to_ptr.vmem [resolvable:$true] %s154_s25 }
   0xf   : > { %s1329_s27 = smov [#allocation7]   ;;  %s1330_s29 = smov [#allocation8]  }
  0x10   : > { %s1704_s23 = scalar_select %p1402_p8, 1, 0 }
  0x11   : > { %p1017_p9 = pneg %p1402_p8  ;;  %s167_s28 = sshll.u32 %s1329_s27, 4  ;;  %s1417_s28 = int_to_ptr.vmem [resolvable:$true] %s167_s28 }
  0x12   : > { %s1419_s30 = sshll.u32 %s1330_s29, 4  ;;  %s1138_s7 = scalar_lea.hbm %s1695_s1, 1024  ;;  %s182_s30 = int_to_ptr.vmem [resolvable:$true] %s1419_s30 }
  0x13   : > { %p1413_p11 = pnand %p1017_p9, %p1699_p1  ;;  %p1139_p12 = scmp.ne.s32.totalorder %s1695_s1, %s1138_s7 }
  0x14   : > { %p1145_p5 = scmp.lt.u32.totalorder %s1138_s7, %s1695_s1 }
  0x15   : > { %p1429_p13 = pneg %p1413_p11 }
  0x17   : > { %p1141_p0 = pnand %p1429_p13, %p1139_p12 }
  0x19   : > { %p1142_p3 = pneg %p1141_p0 }
  0x1b   : > { %p1147_p7 = pnand %p1145_p5, %p1142_p3 }
  0x1d   : > { %1150 = shalt.err (!%p1147_p7)
}
  0x1e   : > { %s1151_s13 = scalar_lea.vmem %s1406_s25, 1024  ;;  %p1159_p2 = scmp.lt.s32.totalorder %s1406_s25, %s1406_s25 }
  0x1f   : > { %p1152_p9 = scmp.ne.s32.totalorder %s1406_s25, %s1151_s13  ;;  %p1160_p6 = scmp.lt.s32.totalorder %s1151_s13, %s1151_s13 }
  0x21   : > { %p1154_p10 = pnand %p1152_p9, %p1429_p13  ;;  %p1161_p12 = por %p1160_p6, %p1159_p2 }
  0x23   : > { %p1155_p1 = pneg %p1154_p10 }
  0x25   : > { %p1162_p0 = pnand %p1161_p12, %p1155_p1 }
  0x27   : > { %1165 = shalt.err (!%p1162_p0)
}
  0x28   : > { %s1331_s14 = smov 64   ;;  %s1332_s20 = smov 4  }
  0x29   : > { %1020 = dma.hbm_to_vmem [thread:$0]  (!%p1413_p11), %s1695_s1, 1024, %s1406_s25, [#allocation6], %s1331_s14, %s1331_s14, %s1332_s20  }
  0x2a   : > { %s1166_s6 = scalar_lea.hbm %s1696_s2, 1024 }
  0x2b   : > { %p1167_p1 = scmp.ne.s32.totalorder %s1696_s2, %s1166_s6  ;;  %p1173_p10 = scmp.lt.u32.totalorder %s1166_s6, %s1696_s2 }
  0x2d   : > { %p1169_p2 = pnand %p1167_p1, %p1429_p13 }
  0x2f   : > { %p1170_p6 = pneg %p1169_p2 }
  0x31   : > { %p1175_p3 = pnand %p1173_p10, %p1170_p6 }
  0x33   : > { %1178 = shalt.err (!%p1175_p3)
}
  0x34   : > { %s1179_s25 = scalar_lea.vmem %s1417_s28, 1024  ;;  %p1187_p12 = scmp.lt.s32.totalorder %s1417_s28, %s1417_s28 }
  0x35   : > { %p1180_p5 = scmp.ne.s32.totalorder %s1417_s28, %s1179_s25  ;;  %p1188_p0 = scmp.lt.s32.totalorder %s1179_s25, %s1179_s25 }
  0x37   : > { %p1182_p7 = pnand %p1180_p5, %p1429_p13  ;;  %p1189_p1 = por %p1188_p0, %p1187_p12 }
  0x39   : > { %p1183_p9 = pneg %p1182_p7 }
  0x3b   : > { %p1190_p2 = pnand %p1189_p1, %p1183_p9 }
  0x3d   : > { %1193 = shalt.err (!%p1190_p2)
}
  0x3e   : > { %1023 = dma.hbm_to_vmem [thread:$0]  (!%p1413_p11), %s1696_s2, 1024, %s1417_s28, [#allocation6], %s1331_s14, %s1331_s14, %s1332_s20  }
  0x3f   : > { %s1194_s29 = scalar_lea.hbm %s1697_s3, 16 }
  0x40   : > { %p1195_p6 = scmp.ne.s32.totalorder %s1697_s3, %s1194_s29  ;;  %p1201_p5 = scmp.lt.u32.totalorder %s1194_s29, %s1697_s3 }
  0x42   : > { %p1197_p10 = pnand %p1195_p6, %p1429_p13 }
  0x44   : > { %p1198_p3 = pneg %p1197_p10 }
  0x46   : > { %p1203_p7 = pnand %p1201_p5, %p1198_p3 }
  0x48   : > { %1206 = shalt.err (!%p1203_p7)
}
  0x49   : > { %s1207_s9 = scalar_lea.vmem %s182_s30, 16  ;;  %s1214_s28 = scalar_lea.vmem %s182_s30, 32 }
  0x4a   : > { %p1208_p9 = scmp.ne.s32.totalorder %s182_s30, %s1207_s9  ;;  %p1215_p1 = scmp.lt.s32.totalorder %s182_s30, %s182_s30 }
  0x4b   : > { %p1216_p2 = scmp.lt.s32.totalorder %s1214_s28, %s1207_s9 }
  0x4c   : > { %p1210_p12 = pnand %p1208_p9, %p1429_p13 }
  0x4d   : > { %p1217_p4 = por %p1216_p2, %p1215_p1 }
  0x4e   : > { %p1211_p0 = pneg %p1210_p12 }
  0x50   : > { %p1218_p8 = pnand %p1217_p4, %p1211_p0 }
  0x52   : > { %1221 = shalt.err (!%p1218_p8)
}
  0x53   : > { %1026 = dma.hbm_to_vmem [thread:$0]  (!%p1413_p11), %s1697_s3, 16, %s182_s30, [#allocation9]  }
  0x54   : > { %s1499_s10 = sadd.s32 1, %s1326_s18   ;;  %s29_s26 = sadd.s32 1, %s1322_s17 }
  0x55   : > { %s26_s12 = ssub.s32 %s1326_s18, %s1499_s10  ;;  %p36_p8 = scmp.ne.s32.totalorder %s1322_s17, %s1318_s16 }
  0x56   : > { %p27_p4 = scmp.eq.s32.totalorder %s26_s12, 0  ;;  %p37_p13 = scmp.eq.s32.totalorder %s1326_s18, 0 }
  0x57   : > { %p1038_p6 = scmp.lt.s32.totalorder %s1326_s18, 2  ;;  %p1707_p3 = scmp.eq.s32.totalorder %s1383_s19, 1 }
  0x58   : > { %s1509_s13 = scalar_select %p27_p4, %s1322_s17, %s29_s26  }
  0x59   : > { %p38_p10 = por %p37_p13, %p36_p8  ;;  %p1513_p5 = por %p1707_p3, %p36_p8 }
  0x5a   : > { %s192_s27 = sand.u32 1, %s1322_s17   ;;  %s903_s29 = sshll.u32 %s1326_s18, 10 }
  0x5b   : > { %s864_s30 = sshll.u32 %s192_s27, 6  ;;  %s1522_s7 = scalar_lea.hbm %s1694_s0, %s903_s29 }
  0x5c   : > { %s196_s8 = scalar_lea.vmem [#allocation2], %s864_s30  ;;  %p1524_p11 = pnand %p1038_p6, %p38_p10 }
  0x5d   : > { %s203_s9 = sshll.u32 %s196_s8, 4  ;;  %s1530_s11 = scalar_lea.sflag [#allocation3], %s192_s27  ;;  %s1528_s9 = int_to_ptr.vmem [resolvable:$true] %s203_s9 }
  0x5e   : > { %s1222_s25 = scalar_lea.hbm %s1522_s7, 1024  ;;  %p1224_p9 = pneg %p1524_p11 }
  0x5f   : > { %p1223_p7 = scmp.ne.s32.totalorder %s1522_s7, %s1222_s25  ;;  %s1227_s29 = scalar_lea.hbm %s1694_s0, 2048 }
  0x60   : > { %p1228_p1 = scmp.lt.u32.totalorder %s1522_s7, %s1694_s0  ;;  %p1229_p2 = scmp.lt.u32.totalorder %s1227_s29, %s1222_s25 }
  0x61   : > { %p1225_p12 = pnand %p1224_p9, %p1223_p7  ;;  %p1231_p8 = scmp.lt.u32.totalorder %s1222_s25, %s1522_s7 }
  0x62   : > { %p1230_p4 = por %p1229_p2, %p1228_p1 }
  0x63   : > { %p1226_p0 = pneg %p1225_p12 }
  0x64   : > { %p1232_p13 = por %p1231_p8, %p1230_p4 }
  0x66   : > { %p1233_p6 = pnand %p1232_p13, %p1226_p0 }
  0x68   : > { %1236 = shalt.err (!%p1233_p6)
}
  0x69   : > { %s1237_s27 = scalar_lea.vmem %s1528_s9, 1024  ;;  %s1333_s6 = smov [#allocation2]  }
  0x6a   : > { %p1238_p10 = scmp.ne.s32.totalorder %s1528_s9, %s1237_s27  ;;  %s1242_s8 = sshll.u32 %s1333_s6, 4  ;;  %s1243_s8 = int_to_ptr.vmem [resolvable:$false] %s1242_s8 }
  0x6b   : > { %s1244_s12 = scalar_lea.vmem %s1243_s8, 2048  ;;  %p1245_p12 = scmp.lt.s32.totalorder %s1528_s9, %s1243_s8 }
  0x6c   : > { %p1240_p3 = pnand %p1238_p10, %p1224_p9  ;;  %p1246_p1 = scmp.lt.s32.totalorder %s1244_s12, %s1237_s27 }
  0x6e   : > { %p1241_p7 = pneg %p1240_p3  ;;  %p1247_p2 = por %p1246_p1, %p1245_p12 }
  0x70   : > { %p1248_p4 = pnand %p1247_p2, %p1241_p7 }
  0x72   : > { %1251 = shalt.err (!%p1248_p4)
}
  0x73   : > { %1030 = dma.hbm_to_vmem [thread:$0]  (!%p1524_p11), %s1522_s7, 1024, %s1528_s9, %s1530_s11, %s1331_s14, %s1331_s14, %s1332_s20  }
  0x74   : > { %p1710_p9 = scmp.ne.s32.totalorder %s1704_s23, 0 }
  0x75   : > { %s1564_s25 = sand.u32 (!%p1710_p9), 1, %s1318_s16   ;;  %p1711_p0 = scmp.ne.s32.totalorder (!%p1710_p9), %s1702_s21, 0 }
  0x76   : > { %215 = sbr.rel (%p1710_p9) target bundleno = 655 (0x28f), region = 36  ;;  %s868_s26 = sshll.u32 (!%p1710_p9), %s1564_s25, 6 }
  0x77   : > { %s218_s29 = scalar_lea.sflag (!%p1710_p9), [#allocation3], %s1564_s25  ;;  %s1568_s30 = scalar_lea.vmem (!%p1710_p9), [#allocation2], %s868_s26 }
  0x7d   : > { %1297 = dma.done.wait (%p1711_p0), %s218_s29, 1024  }
  0x7e   : > { %1299 = vsyncadd (%p1711_p0), %s218_s29, 4294966272  ;;  %p1712_p11 = scmp.eq.s32.totalorder %s1383_s19, 0 }
  0x80   : > { %1301 = dma.done.wait (%p1712_p11), [#allocation6], 2048   ;;  %p1713_p8 = pmov %p1712_p11 }
  0x82   : > { %1303 = vsyncadd (%p1713_p8), [#allocation6], 4294965248  ;;  %p1714_p13 = pmov %p1713_p8 }
  0x83   : > { %p1715_p6 = pmov %p1713_p8 }
  0x84   : > { %1305 = dma.done.wait (%p1714_p13), [#allocation9], 16  }
  0x85   : > { %1307 = vsyncadd (%p1715_p6), [#allocation9], 4294967280  ;;  %v1082_v0 = vld [vmem:[#allocation5] sm:$0xff]   ;;  %v1083_v1 = vld [vmem:[#allocation5 + $0x8] sm:$0xff]   ;;  %s872_s21 = sshll.u32 %s1564_s25, 7  ;;  %s904_s14 = sshll.u32 %s1383_s19, 11 }
  0x86   : > { %937 = vmatprep.subr.bf16.mxu0 %v1082_v0  ;;  %v1084_v2 = vld [vmem:[#allocation5 + $0x10] sm:$0xff]   ;;  %v1085_v3 = vld [vmem:[#allocation5 + $0x18] sm:$0xff]   ;;  %v1090_v4 = vld [vmem:[%s1568_s30] sm:$0xff]   ;;  %s1625_s23 = scalar_lea.vmem [#allocation10], %s872_s21  ;;  %s1645_s28 = scalar_lea.hbm %s1698_s4, %s904_s14 }
  0x87   : > { %938 = vmatpush3.bf16.msra.mxu0 %v1082_v0  ;;  %953 = vmatprep.mubr.bf16.mxu0 %v1090_v4  ;;  %v1086_v5 = vld [vmem:[#allocation5 + $0x20] sm:$0xff]   ;;  %v1087_v6 = vld [vmem:[#allocation5 + $0x28] sm:$0xff]   ;;  %v1088_v9 = vld [vmem:[#allocation5 + $0x30] sm:$0xff]   ;;  %s756_s20 = sshll.u32 %s1625_s23, 4  ;;  %s743_s19 = scalar_lea.sflag [#allocation4], %s1564_s25  ;;  %s1647_s20 = int_to_ptr.vmem [resolvable:$true] %s756_s20 }
  0x88   : > { %939 = vmatprep.subr.bf16.mxu0 %v1083_v1  ;;  %v1098_v7 = vld [vmem:[#allocation7] sm:$0xff]   ;;  %v1099_v8 = vld [vmem:[#allocation7 + $0x8] sm:$0xff]   ;;  %v1089_v10 = vld [vmem:[#allocation5 + $0x38] sm:$0xff]   ;;  %s1252_s11 = scalar_lea.vmem %s1647_s20, 2048  ;;  %s1334_s5 = smov [#allocation10]  }
  0x89   : > { %969 = vmatprep.subr.bf16.mxu1 %v1098_v7  ;;  %v1091_v11 = vld [vmem:[%s1568_s30 + $0x8] sm:$0xff]   ;;  %v1092_v12 = vld [vmem:[%s1568_s30 + $0x10] sm:$0xff]   ;;  %v1093_v13 = vld [vmem:[%s1568_s30 + $0x18] sm:$0xff]   ;;  %p1253_p10 = scmp.ne.s32.totalorder %s1647_s20, %s1252_s11  ;;  %s1256_s27 = sshll.u32 %s1334_s5, 4  ;;  %s1257_s27 = int_to_ptr.vmem [resolvable:$false] %s1256_s27 }
  0x8a   : > { %970 = vmatpush3.bf16.msra.mxu1 %v1098_v7  ;;  %v1094_v14 = vld [vmem:[%s1568_s30 + $0x20] sm:$0xff]   ;;  %v1095_v15 = vld [vmem:[%s1568_s30 + $0x28] sm:$0xff]   ;;  %v1096_v16 = vld [vmem:[%s1568_s30 + $0x30] sm:$0xff]   ;;  %s1258_s6 = scalar_lea.vmem %s1257_s27, 4096  ;;  %p1259_p12 = scmp.lt.s32.totalorder %s1647_s20, %s1257_s27 }
  0x8b   : > { %940 = vmatpush3.bf16.msra.mxu0 %v1083_v1  ;;  %971 = vmatprep.subr.bf16.mxu1 %v1099_v8  ;;  %v1097_v17 = vld [vmem:[%s1568_s30 + $0x38] sm:$0xff]   ;;  %v1100_v18 = vld [vmem:[#allocation7 + $0x10] sm:$0xff]   ;;  %v1102_v20 = vld [vmem:[#allocation7 + $0x20] sm:$0xff]   ;;  %p1254_p3 = pnand %p1253_p10, %p1513_p5  ;;  %p1260_p1 = scmp.lt.s32.totalorder %s1258_s6, %s1252_s11 }
  0x8c   : > { %941 = vmatprep.subr.bf16.mxu0 %v1084_v2  ;;  %v1101_v19 = vld [vmem:[#allocation7 + $0x18] sm:$0xff]   ;;  %v1103_v21 = vld [vmem:[#allocation7 + $0x28] sm:$0xff]   ;;  %v1104_v22 = vld [vmem:[#allocation7 + $0x30] sm:$0xff]  }
  0x8d   : > { %v1105_v23 = vld [vmem:[#allocation7 + $0x38] sm:$0xff]   ;;  %v1590_v32 = vld [vmem:[#allocation8] ss:$0 sm:$0xff]  ;;  %p1255_p7 = pneg %p1254_p3  ;;  %p1261_p2 = por %p1260_p1, %p1259_p12 }
  0x8e   : > { %972 = vmatpush3.bf16.msra.mxu1 %v1099_v8 }
  0x8f   : > { %942 = vmatpush3.bf16.msra.mxu0 %v1084_v2  ;;  %973 = vmatprep.subr.bf16.mxu1 %v1100_v18  ;;  %p1262_p4 = pnand %p1261_p2, %p1255_p7 }
  0x90   : > { %943 = vmatprep.subr.bf16.mxu0 %v1085_v3 }
  0x92   : > { %974 = vmatpush3.bf16.msra.mxu1 %v1100_v18 }
  0x93   : > { %944 = vmatpush3.bf16.msra.mxu0 %v1085_v3  ;;  %975 = vmatprep.subr.bf16.mxu1 %v1101_v19 }
  0x94   : > { %945 = vmatprep.subr.bf16.mxu0 %v1086_v5 }
  0x96   : > { %976 = vmatpush3.bf16.msra.mxu1 %v1101_v19 }
  0x97   : > { %946 = vmatpush3.bf16.msra.mxu0 %v1086_v5  ;;  %977 = vmatprep.subr.bf16.mxu1 %v1102_v20 }
  0x98   : > { %947 = vmatprep.subr.bf16.mxu0 %v1087_v6 }
  0x9a   : > { %978 = vmatpush3.bf16.msra.mxu1 %v1102_v20 }
  0x9b   : > { %948 = vmatpush3.bf16.msra.mxu0 %v1087_v6  ;;  %979 = vmatprep.subr.bf16.mxu1 %v1103_v21 }
  0x9c   : > { %949 = vmatprep.subr.bf16.mxu0 %v1088_v9 }
  0x9e   : > { %980 = vmatpush3.bf16.msra.mxu1 %v1103_v21 }
  0x9f   : > { %950 = vmatpush3.bf16.msra.mxu0 %v1088_v9  ;;  %981 = vmatprep.subr.bf16.mxu1 %v1104_v22 }
  0xa0   : > { %951 = vmatprep.subr.bf16.mxu0 %v1089_v10 }
  0xa2   : > { %982 = vmatpush3.bf16.msra.mxu1 %v1104_v22 }
  0xa3   : > { %952 = vmatpush3.bf16.msra.mxu0 %v1089_v10  ;;  %983 = vmatprep.subr.bf16.mxu1 %v1105_v23 }
  0xa6   : > { %954 = vmatmul.mubr.bf16.vlgmr.msra.gmra.mrb[0].mxu0 %v1091_v11  ;;  %984 = vmatpush3.bf16.msra.mxu1 %v1105_v23 }
  0xa7   : > { %957 = vmatprep.mubr.bf16.mxu0 %v1092_v12 }
  0xae   : > { %958 = vmatmul.mubr.bf16.gmra.mrb[4].mxu0 %v1093_v13 }
  0xaf   : > { %961 = vmatprep.mubr.bf16.mxu0 %v1094_v14 }
  0xb6   : > { %962 = vmatmul.mubr.bf16.gmra.mrb[8].mxu0 %v1095_v15 }
  0xb7   : > { %965 = vmatprep.mubr.bf16.mxu0 %v1096_v16 }
  0xbe   : > { %966 = vmatmul.mubr.bf16.gmra.mrb[12].mxu0 %v1097_v17 }
 0x179   : > { %v955_v24 = vpop.f32.mrb[0].mxu0 }
 0x17a   : > { %1106 = vtanh.f32 %v955_v24  ;;  %v440_v25 = vpop.f32.mrb[1].mxu0 }
 0x17b   : > { %1108 = vtanh.f32 %v440_v25  ;;  %v956_v26 = vpop.f32.mrb[2].mxu0 }
 0x17c   : > { %1110 = vtanh.f32 %v956_v26  ;;  %v443_v27 = vpop.f32.mrb[3].mxu0 }
 0x17d   : > { %1112 = vtanh.f32 %v443_v27 }
 0x181   : > { %v959_v28 = vpop.f32.mrb[4].mxu0 }
 0x182   : > { %1114 = vtanh.f32 %v959_v28  ;;  %v456_v29 = vpop.f32.mrb[5].mxu0 }
 0x183   : > { %1116 = vtanh.f32 %v456_v29  ;;  %v960_v30 = vpop.f32.mrb[6].mxu0 }
 0x184   : > { %v1107_v31 = vpop.eup %1106  ;;  %1118 = vtanh.f32 %v960_v30  ;;  %v459_v33 = vpop.f32.mrb[7].mxu0 }
 0x185   : > { %v1109_v34 = vpop.eup %1108  ;;  %v521_v35 = vmul.f32 %v1107_v31, %v1107_v31  ;;  %1120 = vtanh.f32 %v459_v33 }
 0x186   : > { %v1111_v36 = vpop.eup %1110  ;;  %v519_v37 = vmul.f32 %v1109_v34, %v1109_v34 }
 0x187   : > { %v1113_v38 = vpop.eup %1112  ;;  %v543_v39 = vmul.f32 %v1590_v32, %v521_v35  ;;  %v522_v40 = vmul.f32 %v1111_v36, %v1111_v36 }
 0x188   : > { %v520_v41 = vmul.f32 %v1113_v38, %v1113_v38  ;;  %v541_v42 = vmul.f32 %v1590_v32, %v519_v37 }
 0x189   : > { %v544_v43 = vmul.f32 %v1590_v32, %v522_v40  ;;  %v963_v44 = vpop.f32.mrb[8].mxu0  ;;  %v559_v48 = vsub.f32 %v1590_v32, %v543_v39 }
 0x18a   : > { %1122 = vtanh.f32 %v963_v44  ;;  %v472_v45 = vpop.f32.mrb[9].mxu0  ;;  %v542_v46 = vmul.f32 %v1590_v32, %v520_v41  ;;  %v557_v52 = vsub.f32 %v1590_v32, %v541_v42 }
 0x18b   : > { %1124 = vtanh.f32 %v472_v45  ;;  %v964_v47 = vpop.f32.mrb[10].mxu0  ;;  %v560_v49 = vsub.f32 %v1590_v32, %v544_v43 }
 0x18c   : > { %v1115_v50 = vpop.eup %1114  ;;  %1126 = vtanh.f32 %v964_v47  ;;  %v475_v51 = vpop.f32.mrb[11].mxu0  ;;  %v558_v53 = vsub.f32 %v1590_v32, %v542_v46 }
 0x18d   : > { %v1117_v54 = vpop.eup %1116  ;;  %v525_v55 = vmul.f32 %v1115_v50, %v1115_v50  ;;  %1128 = vtanh.f32 %v475_v51  ;;  %v574_v56 = vpack.c.bf16 %v560_v49, %v559_v48 }
 0x18e   : > { %v1119_v57 = vpop.eup %1118  ;;  %v523_v58 = vmul.f32 %v1117_v54, %v1117_v54  ;;  %v573_v59 = vpack.c.bf16 %v558_v53, %v557_v52 }
 0x18f   : > { %v1121_v60 = vpop.eup %1120  ;;  %v547_v61 = vmul.f32 %v1590_v32, %v525_v55  ;;  %v526_v62 = vmul.f32 %v1119_v57, %v1119_v57 }
 0x190   : > { %v545_v63 = vmul.f32 %v1590_v32, %v523_v58  ;;  %v524_v0 = vmul.f32 %v1121_v60, %v1121_v60  ;;  %985 = vmatprep.mubr.bf16.mxu1 %v573_v59 }
 0x191   : > { %v548_v1 = vmul.f32 %v1590_v32, %v526_v62  ;;  %v967_v2 = vpop.f32.mrb[12].mxu0  ;;  %986 = vmatmul.mubr.bf16.vlgmr.msra.gmra.mrb[0].mxu1 %v574_v56  ;;  %v563_v6 = vsub.f32 %v1590_v32, %v547_v61 }
 0x192   : > { %v546_v3 = vmul.f32 %v1590_v32, %v524_v0  ;;  %1130 = vtanh.f32 %v967_v2  ;;  %v488_v4 = vpop.f32.mrb[13].mxu0  ;;  %v561_v10 = vsub.f32 %v1590_v32, %v545_v63 }
 0x193   : > { %1132 = vtanh.f32 %v488_v4  ;;  %v968_v5 = vpop.f32.mrb[14].mxu0  ;;  %v564_v7 = vsub.f32 %v1590_v32, %v548_v1 }
 0x194   : > { %v1123_v8 = vpop.eup %1122  ;;  %1134 = vtanh.f32 %v968_v5  ;;  %v491_v9 = vpop.f32.mrb[15].mxu0  ;;  %v562_v11 = vsub.f32 %v1590_v32, %v546_v3 }
 0x195   : > { %v1125_v12 = vpop.eup %1124  ;;  %v529_v13 = vmul.f32 %v1123_v8, %v1123_v8  ;;  %1136 = vtanh.f32 %v491_v9  ;;  %v576_v14 = vpack.c.bf16 %v564_v7, %v563_v6 }
 0x196   : > { %v1127_v15 = vpop.eup %1126  ;;  %v527_v16 = vmul.f32 %v1125_v12, %v1125_v12  ;;  %v575_v17 = vpack.c.bf16 %v562_v11, %v561_v10 }
 0x197   : > { %v1129_v18 = vpop.eup %1128  ;;  %v551_v19 = vmul.f32 %v1590_v32, %v529_v13  ;;  %v530_v20 = vmul.f32 %v1127_v15, %v1127_v15 }
 0x198   : > { %v549_v21 = vmul.f32 %v1590_v32, %v527_v16  ;;  %v528_v22 = vmul.f32 %v1129_v18, %v1129_v18  ;;  %989 = vmatprep.mubr.bf16.mxu1 %v575_v17 }
 0x199   : > { %v552_v23 = vmul.f32 %v1590_v32, %v530_v20  ;;  %990 = vmatmul.mubr.bf16.gmra.mrb[4].mxu1 %v576_v14  ;;  %v567_v25 = vsub.f32 %v1590_v32, %v551_v19 }
 0x19a   : > { %v550_v24 = vmul.f32 %v1590_v32, %v528_v22  ;;  %v565_v28 = vsub.f32 %v1590_v32, %v549_v21 }
 0x19b   : > { %v568_v26 = vsub.f32 %v1590_v32, %v552_v23 }
 0x19c   : > { %v1131_v27 = vpop.eup %1130  ;;  %v566_v29 = vsub.f32 %v1590_v32, %v550_v24 }
 0x19d   : > { %v1133_v30 = vpop.eup %1132  ;;  %v533_v31 = vmul.f32 %v1131_v27, %v1131_v27  ;;  %v578_v33 = vpack.c.bf16 %v568_v26, %v567_v25 }
 0x19e   : > { %v1135_v34 = vpop.eup %1134  ;;  %v531_v35 = vmul.f32 %v1133_v30, %v1133_v30  ;;  %v577_v36 = vpack.c.bf16 %v566_v29, %v565_v28 }
 0x19f   : > { %v1137_v37 = vpop.eup %1136  ;;  %v555_v38 = vmul.f32 %v1590_v32, %v533_v31  ;;  %v534_v39 = vmul.f32 %v1135_v34, %v1135_v34 }
 0x1a0   : > { %v553_v40 = vmul.f32 %v1590_v32, %v531_v35  ;;  %v532_v41 = vmul.f32 %v1137_v37, %v1137_v37  ;;  %993 = vmatprep.mubr.bf16.mxu1 %v577_v36 }
 0x1a1   : > { %v556_v42 = vmul.f32 %v1590_v32, %v534_v39  ;;  %994 = vmatmul.mubr.bf16.gmra.mrb[8].mxu1 %v578_v33  ;;  %v571_v44 = vsub.f32 %v1590_v32, %v555_v38 }
 0x1a2   : > { %v554_v43 = vmul.f32 %v1590_v32, %v532_v41  ;;  %v569_v46 = vsub.f32 %v1590_v32, %v553_v40 }
 0x1a3   : > { %v572_v45 = vsub.f32 %v1590_v32, %v556_v42 }
 0x1a4   : > { %v570_v47 = vsub.f32 %v1590_v32, %v554_v43 }
 0x1a5   : > { %v580_v48 = vpack.c.bf16 %v572_v45, %v571_v44 }
 0x1a6   : > { %v579_v49 = vpack.c.bf16 %v570_v47, %v569_v46 }
 0x1a8   : > { %997 = vmatprep.mubr.bf16.mxu1 %v579_v49 }
 0x1a9   : > { %998 = vmatmul.mubr.bf16.gmra.mrb[12].mxu1 %v580_v48 }
 0x264   : > { %v987_v50 = vpop.f32.mrb[0].mxu1 }
 0x265   : > { %728 = vst [vmem:[%s1625_s23 + $0x10] sm:$0xff] %v987_v50  ;;  %v663_v51 = vpop.f32.mrb[1].mxu1 }
 0x266   : > { %726 = vst [vmem:[%s1625_s23] sm:$0xff] %v663_v51  ;;  %v988_v32 = vpop.f32.mrb[2].mxu1 }
 0x267   : > { %729 = vst [vmem:[%s1625_s23 + $0x18] sm:$0xff] %v988_v32  ;;  %v666_v52 = vpop.f32.mrb[3].mxu1 }
 0x268   : > { %727 = vst [vmem:[%s1625_s23 + $0x8] sm:$0xff] %v666_v52 }
 0x26c   : > { %v991_v53 = vpop.f32.mrb[4].mxu1 }
 0x26d   : > { %732 = vst [vmem:[%s1625_s23 + $0x30] sm:$0xff] %v991_v53  ;;  %v679_v54 = vpop.f32.mrb[5].mxu1 }
 0x26e   : > { %730 = vst [vmem:[%s1625_s23 + $0x20] sm:$0xff] %v679_v54  ;;  %v992_v55 = vpop.f32.mrb[6].mxu1 }
 0x26f   : > { %733 = vst [vmem:[%s1625_s23 + $0x38] sm:$0xff] %v992_v55  ;;  %v682_v56 = vpop.f32.mrb[7].mxu1 }
 0x270   : > { %731 = vst [vmem:[%s1625_s23 + $0x28] sm:$0xff] %v682_v56 }
 0x274   : > { %v995_v57 = vpop.f32.mrb[8].mxu1 }
 0x275   : > { %736 = vst [vmem:[%s1625_s23 + $0x50] sm:$0xff] %v995_v57  ;;  %v695_v58 = vpop.f32.mrb[9].mxu1 }
 0x276   : > { %734 = vst [vmem:[%s1625_s23 + $0x40] sm:$0xff] %v695_v58  ;;  %v996_v59 = vpop.f32.mrb[10].mxu1 }
 0x277   : > { %737 = vst [vmem:[%s1625_s23 + $0x58] sm:$0xff] %v996_v59  ;;  %v698_v60 = vpop.f32.mrb[11].mxu1 }
 0x278   : > { %735 = vst [vmem:[%s1625_s23 + $0x48] sm:$0xff] %v698_v60 }
 0x27c   : > { %v999_v61 = vpop.f32.mrb[12].mxu1 }
 0x27d   : > { %740 = vst [vmem:[%s1625_s23 + $0x70] sm:$0xff] %v999_v61  ;;  %v711_v62 = vpop.f32.mrb[13].mxu1 }
 0x27e   : > { %738 = vst [vmem:[%s1625_s23 + $0x60] sm:$0xff] %v711_v62  ;;  %v1000_v63 = vpop.f32.mrb[14].mxu1 }
 0x27f   : > { %741 = vst [vmem:[%s1625_s23 + $0x78] sm:$0xff] %v1000_v63  ;;  %v714_v0 = vpop.f32.mrb[15].mxu1 }
 0x280   : > { %739 = vst [vmem:[%s1625_s23 + $0x68] sm:$0xff] %v714_v0 }
 0x281   : > { %1265 = shalt.err (!%p1262_p4)
}
 0x282   : > { %s1266_s8 = scalar_lea.hbm %s1645_s28, 2048  ;;  %s1270_s29 = scalar_lea.hbm %s1698_s4, 4096 }
 0x283   : > { %p1267_p9 = scmp.ne.s32.totalorder %s1645_s28, %s1266_s8  ;;  %p1271_p8 = scmp.lt.u32.totalorder %s1645_s28, %s1698_s4 }
 0x284   : > { %p1272_p13 = scmp.lt.u32.totalorder %s1270_s29, %s1266_s8  ;;  %p1274_p10 = scmp.lt.u32.totalorder %s1266_s8, %s1645_s28 }
 0x285   : > { %p1268_p0 = pnand %p1267_p9, %p1513_p5 }
 0x286   : > { %p1273_p6 = por %p1272_p13, %p1271_p8 }
 0x287   : > { %p1269_p11 = pneg %p1268_p0 }
 0x288   : > { %p1275_p3 = por %p1274_p10, %p1273_p6 }
 0x28a   : > { %p1276_p7 = pnand %p1275_p3, %p1269_p11 }
 0x28c   : > { %1279 = shalt.err (!%p1276_p7)
}
 0x28d   : > { %s1335_s23 = smov 128   ;;  %s1336_s14 = smov 8  }
 0x28e   : > { %1015 = dma.vmem_to_hbm [thread:$0]  (%p1513_p5), %s1647_s20, 2048, %s1645_s28, %s743_s19, %s1335_s23, %s1335_s23, %s1336_s14  }
 0x28f PF: > { %s771_s7 = sand.u32 1, %s1314_s15   ;;  %p1716_p12 = scmp.ne.s32.totalorder %s1703_s22, 0 }
 0x290   : > { %p1717_p1 = scmp.ge.s32.totalorder %s1326_s18, 2  ;;  %s772_s9 = scalar_lea.sflag [#allocation4], %s771_s7 }
 0x292   : > { %p1032_p2 = pnand %p1717_p1, %p1716_p12 }
 0x294   : > { %1309 = dma.done.wait (!%p1032_p2), %s772_s9, 2048  }
 0x295   : > { %1311 = vsyncadd (!%p1032_p2), %s772_s9, 4294965248  ;;  %p19_p4 = scmp.ge.s32.totalorder %s1499_s10, 4   ;;  %s1718_s15 = smov %s1318_s16 }
 0x296   : > { %s1719_s16 = smov %s1322_s17  ;;  %s1720_s17 = smov %s1509_s13 }
 0x297   : > { %s1721_s18 = smov %s1499_s10  ;;  %21 = sbr.rel (!%p19_p4) target bundleno = 7 (0x7), region = 93 }
 0x29e   :  { %777 = vsyncpa [#allocation3], 1 }
 0x29f   :  { %779 = vsyncpa [#allocation3 + $0x1], 1 }
 0x2a0   :  { %780 = vsyncpa [#allocation6], 1 }
 0x2a1   :  { %781 = vsyncpa [#allocation9], 1 }
 0x2a2   :  { %782 = vsyncpa [#allocation4], 1 }
 0x2a3   :  { %784 = vsyncpa [#allocation4 + $0x1], 1 }

</bundles_post_ra>
